<compile_context>
chip_gen: v6e
topology: v6e:2x2x1
jax: 0.10.0
libtpu: 0.0.40
codegen_flags: <defaults>
</compile_context>

<pallas_src>
import numpy as np
import jax
import jax.numpy as jnp
from jax.experimental import pallas as pl
from jax.experimental.pallas import tpu as pltpu


# ----------------------------- Pallas kernel --------------------------------
def _mention_score_kernel(x_ref, ws_ref, w1_ref, b1_ref, w2t_ref, out_ref):
    # First layer on the MXU: [tile_c, Din](bf16) @ [Din, H](bf16) -> f32 acc.
    h = jnp.dot(x_ref[...], w1_ref[...], preferred_element_type=jnp.float32)
    h = jnp.maximum(h + b1_ref[...], 0.0)                       # bias + ReLU (f32, VPU)

    # Second layer as (8, H) @ (tile_c, H)^T -> (8, tile_c): lane-dense result,
    # full MXU output width; only row 0 of w2t is the real output weight.
    logits8 = jax.lax.dot_general(
        w2t_ref[...], h,
        dimension_numbers=(((1,), (1,)), ((), ())),
        preferred_element_type=jnp.float32)

    # Add per-candidate width-prior score (+ folded output biases) and store a
    # lane-dense (1, tile_c) row.
    out_ref[...] = logits8[0:1, :] + ws_ref[...]


def mention_scores_pallas(x, ws, w1, b1, w2t8, *, tile_c):
    """x: [c_pad, Din] bf16, ws: [num_tiles, tile_c] f32 -> logits [c_pad] f32."""
    c_pad, d_in = x.shape
    num_tiles, tc = ws.shape
    assert tc == tile_c and c_pad == num_tiles * tile_c
    h = w1.shape[1]

    out = pl.pallas_call(
        _mention_score_kernel,
        out_shape=jax.ShapeDtypeStruct((num_tiles, tile_c), jnp.float32),
        grid_spec=pltpu.PrefetchScalarGridSpec(
            num_scalar_prefetch=0,
            grid=(num_tiles,),
            in_specs=[
                pl.BlockSpec((tile_c, d_in), lambda i: (i, 0)),   # candidate tile (bf16)
                pl.BlockSpec((1, tile_c), lambda i: (i, 0)),      # width scores (lane-dense)
                pl.BlockSpec((d_in, h), lambda i: (0, 0)),        # W1 (bf16, resident)
                pl.BlockSpec((1, h), lambda i: (0, 0)),           # b1
                pl.BlockSpec((8, h), lambda i: (0, 0)),           # W2^T in row 0
            ],
            out_specs=pl.BlockSpec((1, tile_c), lambda i: (i, 0)),
        ),
        # For production sizes (mlp_size=1000, hsize~1024, tile_c>=2048) raise
        # vmem_limit_bytes here; at the default tile sizes it is unnecessary.
        compiler_params=pltpu.CompilerParams(
            dimension_semantics=("parallel",)),
    )(x, ws, w1, b1, w2t8)
    return out.reshape(-1)


# ----------------------------- glue (plain JAX) ------------------------------
def get_candidate_endpoints(num_words, max_span_width, sentence_map):
    # mirrors BaseController.get_candidate_endpoints (concrete, host-side)
    cand_starts = np.repeat(np.arange(num_words)[:, None], max_span_width, axis=1)
    cand_ends = cand_starts + np.arange(max_span_width)[None, :]
    corr_cand_ends = np.minimum(cand_ends, num_words - 1)
    c1 = cand_ends < num_words
    c2 = sentence_map[cand_starts] == sentence_map[corr_cand_ends]
    mask = (c1 & c2).reshape(-1)
    return cand_starts.reshape(-1)[mask], cand_ends.reshape(-1)[mask]


def get_span_embeddings(encoded_doc, starts, ends, span_width_emb_table):
    # endpoint mention embedding: [start_emb ; end_emb ; width_emb]
    width_idx = ends - starts
    return jnp.concatenate(
        [encoded_doc[starts, :], encoded_doc[ends, :],
         span_width_emb_table[width_idx, :]], axis=1)


def get_pred_mentions(encoded_doc, starts, ends, params, cfg, tile_c=1024):
    num_words = encoded_doc.shape[0]
    c = int(starts.shape[0])
    c_pad = ((c + tile_c - 1) // tile_c) * tile_c
    num_tiles = c_pad // tile_c
    width_idx = ends - starts

    # Mention-MLP input, fed to the kernel in bf16 (halves HBM traffic; MXU
    # accumulates in f32).
    span_embs = get_span_embeddings(encoded_doc, starts, ends,
                                    params["span_width_emb"])
    x = jnp.pad(span_embs.astype(jnp.bfloat16), ((0, c_pad - c), (0, 0)))

    # Span-width-prior MLP depends only on width_idx (<= max_span_width distinct
    # values): evaluate it once on the tiny embedding table, gather the scalar
    # per candidate, and fold the mention-MLP output bias into it.
    wtab = params["span_width_prior_emb"]
    hpw = jax.nn.relu(wtab @ params["ww1"] + params["bw1"])
    width_prior_scores = (hpw @ params["ww2"] + params["bw2"])[:, 0]
    ws = width_prior_scores[width_idx] + params["bm2"][0, 0]
    ws = jnp.pad(ws.astype(jnp.float32), (0, c_pad - c)).reshape(num_tiles, tile_c)

    w1 = params["wm1"].astype(jnp.bfloat16)
    b1 = params["bm1"].astype(jnp.float32)
    h = params["wm1"].shape[1]
    w2t8 = jnp.zeros((8, h), jnp.float32).at[0].set(params["wm2"][:, 0])

    logits = mention_scores_pallas(x, ws, w1, b1, w2t8, tile_c=tile_c)  # (c_pad,)
    valid = jnp.arange(c_pad) < c
    masked_logits = jnp.where(valid, logits, -1e9)

    # top-k (clamped to the number of valid candidates) + lexicographic sort
    k = int(cfg["top_span_ratio"] * num_words)
    k = max(1, min(k, c))
    topk_scores, topk_idx = jax.lax.top_k(masked_logits, k)
    starts_pad = jnp.pad(jnp.asarray(starts), (0, c_pad - c))
    ends_pad = jnp.pad(jnp.asarray(ends), (0, c_pad - c))
    topk_starts = starts_pad[topk_idx]
    topk_ends = ends_pad[topk_idx]
    order = jnp.lexsort((topk_ends, topk_starts))   # primary: start, secondary: end
    return topk_starts[order], topk_ends[order], topk_scores[order], logits[:c]


# pure-JAX reference of the fused scoring path (same bf16 quantization of the
# mention-MLP first layer as the kernel; width MLP per candidate, as in the
# original module).
def _ref_scores(span_embs, wprior_embs, p):
    xb = span_embs.astype(jnp.bfloat16)
    w1b = p["wm1"].astype(jnp.bfloat16)
    hm = jax.nn.relu(jnp.dot(xb, w1b, preferred_element_type=jnp.float32) + p["bm1"])
    lm = hm @ p["wm2"] + p["bm2"]
    hw = jax.nn.relu(wprior_embs @ p["ww1"] + p["bw1"])
    lw = hw @ p["ww2"] + p["bw2"]
    return (lm + lw)[:, 0]


if __name__ == "__main__":
    # small, module-consistent shapes
    num_words = 64
    hsize = 32               # doc_encoder.hsize
    emb_size = 20            # BaseController emb_size
    mlp_size = 64            # mention_mlp / span_width_mlp hidden size (scaled down)
    max_span_width = 8       # scaled down from 20
    cfg = {"top_span_ratio": 0.4}
    d_in = 2 * hsize + emb_size  # 'endpoint' mention embedding

    key = jax.random.PRNGKey(0)
    ks = jax.random.split(key, 12)
    s = 0.05
    params = {
        # embedding tables
        "span_width_emb": jax.random.normal(ks[0], (max_span_width, emb_size), jnp.float32) * s,
        "span_width_prior_emb": jax.random.normal(ks[1], (max_span_width, emb_size), jnp.float32) * s,
        # mention_mlp: Linear(d_in, mlp) -> ReLU -> Linear(mlp, 1)
        "wm1": jax.random.normal(ks[2], (d_in, mlp_size), jnp.float32) * s,
        "bm1": jax.random.normal(ks[3], (1, mlp_size), jnp.float32) * s,
        "wm2": jax.random.normal(ks[4], (mlp_size, 1), jnp.float32) * s,
        "bm2": jax.random.normal(ks[5], (1, 1), jnp.float32) * s,
        # span_width_mlp: Linear(emb, mlp) -> ReLU -> Linear(mlp, 1)
        "ww1": jax.random.normal(ks[6], (emb_size, mlp_size), jnp.float32) * s,
        "bw1": jax.random.normal(ks[7], (1, mlp_size), jnp.float32) * s,
        "ww2": jax.random.normal(ks[8], (mlp_size, 1), jnp.float32) * s,
        "bw2": jax.random.normal(ks[9], (1, 1), jnp.float32) * s,
    }

    # synthetic "encoded_doc" standing in for the doc encoder output
    encoded_doc = jax.random.normal(ks[10], (num_words, hsize), jnp.float32)
    sentence_map = (np.arange(num_words) // 16).astype(np.int32)

    starts, ends = get_candidate_endpoints(num_words, max_span_width, sentence_map)
    starts = jnp.asarray(starts, jnp.int32)
    ends = jnp.asarray(ends, jnp.int32)

    pred_starts, pred_ends, pred_scores, logits = get_pred_mentions(
        encoded_doc, starts, ends, params, cfg, tile_c=1024)
    jax.block_until_ready((pred_starts, pred_ends, pred_scores, logits))

    # correctness check of the fused Pallas scoring path against pure JAX
    span_embs = get_span_embeddings(encoded_doc, starts, ends, params["span_width_emb"])
    wprior_embs = params["span_width_prior_emb"][ends - starts, :]
    ref = _ref_scores(span_embs, wprior_embs, params)
    np.testing.assert_allclose(np.asarray(logits), np.asarray(ref), rtol=2e-3, atol=2e-3)

    print("KERNEL_OK")
</pallas_src>

<mosaic_0001>
module attributes {stable_mosaic.version = 11 : i64} {
  func.func @_mention_score_kernel(%arg0: i32, %arg1: memref<1024x84xbf16, #tpu.memory_space<vmem>>, %arg2: memref<1x1024xf32, #tpu.memory_space<vmem>>, %arg3: memref<84x64xbf16, #tpu.memory_space<vmem>>, %arg4: memref<1x64xf32, #tpu.memory_space<vmem>>, %arg5: memref<8x64xf32, #tpu.memory_space<vmem>>, %arg6: memref<1x1024xf32, #tpu.memory_space<vmem>>) attributes {dimension_semantics = [#tpu.dimension_semantics<parallel>], iteration_bounds = array<i64: 1>, scalar_prefetch = 0 : i64, scratch_operands = 0 : i64, tpu.core_type = #tpu.core_type<tc>, window_params = [{transform_indices = @transform_0, window_bounds = array<i64: 1024, 84>}, {transform_indices = @transform_1, window_bounds = array<i64: 1, 1024>}, {pipeline_mode = #tpu.pipeline_mode<synchronous>, transform_indices = @transform_2, window_bounds = array<i64: 84, 64>}, {pipeline_mode = #tpu.pipeline_mode<synchronous>, transform_indices = @transform_3, window_bounds = array<i64: 1, 64>}, {pipeline_mode = #tpu.pipeline_mode<synchronous>, transform_indices = @transform_4, window_bounds = array<i64: 8, 64>}, {transform_indices = @transform_5, window_bounds = array<i64: 1, 1024>}]} {
    %c0 = arith.constant 0 : index
    %c0_0 = arith.constant 0 : index
    %0 = vector.load %arg1[%c0, %c0_0] : memref<1024x84xbf16, #tpu.memory_space<vmem>>, vector<1024x84xbf16>
    %c0_1 = arith.constant 0 : index
    %c0_2 = arith.constant 0 : index
    %1 = vector.load %arg3[%c0_1, %c0_2] : memref<84x64xbf16, #tpu.memory_space<vmem>>, vector<84x64xbf16>
    %cst = arith.constant dense<0.000000e+00> : vector<1024x64xf32>
    %2 = tpu.matmul %0, %1, %cst {dimension_numbers = #tpu.dot_dimension_numbers<[1], [0], [0], [1], [0, 0, 1, 1], [], []>} : vector<1024x84xbf16>, vector<84x64xbf16>, vector<1024x64xf32> -> vector<1024x64xf32>
    %c0_3 = arith.constant 0 : index
    %c0_4 = arith.constant 0 : index
    %3 = vector.load %arg4[%c0_3, %c0_4] : memref<1x64xf32, #tpu.memory_space<vmem>>, vector<1x64xf32>
    %4 = vector.broadcast %3 : vector<1x64xf32> to vector<1024x64xf32>
    %5 = arith.addf %2, %4 : vector<1024x64xf32>
    %cst_5 = arith.constant 0.000000e+00 : f32
    %6 = vector.broadcast %cst_5 : f32 to vector<1024x64xf32>
    %7 = arith.maximumf %5, %6 : vector<1024x64xf32>
    %c0_6 = arith.constant 0 : index
    %c0_7 = arith.constant 0 : index
    %8 = vector.load %arg5[%c0_6, %c0_7] : memref<8x64xf32, #tpu.memory_space<vmem>>, vector<8x64xf32>
    %cst_8 = arith.constant dense<0.000000e+00> : vector<8x1024xf32>
    %9 = tpu.matmul %8, %7, %cst_8 {dimension_numbers = #tpu.dot_dimension_numbers<[1], [1], [0], [0], [0, 0, 1, 0], [], []>} : vector<8x64xf32>, vector<1024x64xf32>, vector<8x1024xf32> -> vector<8x1024xf32>
    %10 = vector.extract_strided_slice %9 {offsets = [0, 0], sizes = [1, 1024], strides = [1, 1]} : vector<8x1024xf32> to vector<1x1024xf32>
    %c0_9 = arith.constant 0 : index
    %c0_10 = arith.constant 0 : index
    %11 = vector.load %arg2[%c0_9, %c0_10] : memref<1x1024xf32, #tpu.memory_space<vmem>>, vector<1x1024xf32>
    %12 = arith.addf %10, %11 : vector<1x1024xf32>
    %c0_11 = arith.constant 0 : index
    %c0_12 = arith.constant 0 : index
    %13 = vector.load %arg6[%c0_11, %c0_12] : memref<1x1024xf32, #tpu.memory_space<vmem>>, vector<1x1024xf32>
    tpu.vector_store %arg6[%c0_11, %c0_12], %12 {strides = array<i32>} : memref<1x1024xf32, #tpu.memory_space<vmem>>, vector<1x1024xf32>,
    return
  }
  func.func @transform_0(%arg0: i32) -> (i32, i32) {
    %c0_i32 = arith.constant 0 : i32
    %c0_i32_0 = arith.constant 0 : i32
    return %arg0, %c0_i32 : i32, i32
  }
  func.func @transform_1(%arg0: i32) -> (i32, i32) {
    %c0_i32 = arith.constant 0 : i32
    %c0_i32_0 = arith.constant 0 : i32
    return %arg0, %c0_i32 : i32, i32
  }
  func.func @transform_2(%arg0: i32) -> (i32, i32) {
    %c0_i32 = arith.constant 0 : i32
    %c0_i32_0 = arith.constant 0 : i32
    %c0_i32_1 = arith.constant 0 : i32
    return %c0_i32, %c0_i32_0 : i32, i32
  }
  func.func @transform_3(%arg0: i32) -> (i32, i32) {
    %c0_i32 = arith.constant 0 : i32
    %c0_i32_0 = arith.constant 0 : i32
    %c0_i32_1 = arith.constant 0 : i32
    return %c0_i32, %c0_i32_0 : i32, i32
  }
  func.func @transform_4(%arg0: i32) -> (i32, i32) {
    %c0_i32 = arith.constant 0 : i32
    %c0_i32_0 = arith.constant 0 : i32
    %c0_i32_1 = arith.constant 0 : i32
    return %c0_i32, %c0_i32_0 : i32, i32
  }
  func.func @transform_5(%arg0: i32) -> (i32, i32) {
    %c0_i32 = arith.constant 0 : i32
    %c0_i32_0 = arith.constant 0 : i32
    return %arg0, %c0_i32 : i32, i32
  }
}

</mosaic_0001>

<bundles_post_ra>
// kernel: tpu_custom_call.1
= control target key start
LH: loop header
LB: loop body
LE: loop exit
PB: predicated region body
PF: predicated region fallthrough
CT: control target
= control target key end

     0   :  { %vm714_vm0 = vcmask 1041408   ;;  %vm521_vm1 = vcmask 687104   ;;  %s3765_s0 = inlined_call_operand.vmem [shape: bf16[1024,84], index: 0, kind: input, shape index: {}]   ;;  %s3766_s1 = inlined_call_operand.vmem [shape: f32[1,1024], index: 1, kind: input, shape index: {}]   ;;  %s3767_s2 = inlined_call_operand.vmem [shape: bf16[84,64], index: 2, kind: input, shape index: {}]   ;;  %s3768_s3 = inlined_call_operand.vmem [shape: f32[1,64], index: 3, kind: input, shape index: {}]   ;;  %s3769_s4 = inlined_call_operand.vmem [shape: f32[8,64], index: 4, kind: input, shape index: {}]   ;;  %s3770_s5 = inlined_call_operand.hbm [shape: f32[1,1024], index: 5, kind: output, shape index: {}]  }
   0x1   :  { %v2803_v0 = vld [vmem:[%s3767_s2 + $0x28] ss:$0 sps:$4 sm:$0x33]   ;;  %v2804_v1 = vld [vmem:[%s3767_s2 + $0x20] sm:$0xff]   ;;  %v2805_v3 = vld [vmem:[%s3767_s2 + $0x18] sm:$0xff]  }
   0x2   :  { %2800 = vmatprep.subr.msk.bf16.mxu0 %vm714_vm0, %v2803_v0  ;;  %v716_v2 = vsel %vm714_vm0, %v2803_v0, 0  ;;  %v2809_v4 = vld [vmem:[%s3765_s0] sm:$0xff]   ;;  %v2806_v5 = vld [vmem:[%s3767_s2 + $0x10] sm:$0xff]   ;;  %v2807_v6 = vld [vmem:[%s3767_s2 + $0x8] sm:$0xff]  }
   0x3   :  { %2661 = vmatpush3.bf16.msra.mxu0 %v716_v2  ;;  %2672 = vmatprep.mubr.msk.bf16.mxu0 %vm521_vm1, %v2809_v4  ;;  %v2808_v7 = vld [vmem:[%s3767_s2] sm:$0xff]   ;;  %v2810_v8 = vld [vmem:[%s3765_s0 + $0x8] sm:$0xff]   ;;  %v2811_v9 = vld [vmem:[%s3765_s0 + $0x10] sm:$0xff]  }
   0x4   :  { %2662 = vmatprep.subr.bf16.mxu0 %v2804_v1  ;;  %v2812_v10 = vld [vmem:[%s3765_s0 + $0x18] sm:$0xff]   ;;  %v2813_v11 = vld [vmem:[%s3765_s0 + $0x20] sm:$0xff]   ;;  %v2814_v12 = vld [vmem:[%s3765_s0 + $0x28] sm:$0xff]  }
   0x5   :  { %v2815_v13 = vld [vmem:[%s3765_s0 + $0x30] sm:$0xff]   ;;  %v2816_v14 = vld [vmem:[%s3765_s0 + $0x38] sm:$0xff]   ;;  %v2817_v15 = vld [vmem:[%s3765_s0 + $0x40] sm:$0xff]  }
   0x6   :  { %v2818_v16 = vld [vmem:[%s3765_s0 + $0x48] sm:$0xff]   ;;  %v2819_v17 = vld [vmem:[%s3765_s0 + $0x50] sm:$0xff]   ;;  %v2820_v18 = vld [vmem:[%s3765_s0 + $0x58] sm:$0xff]  }
   0x7   :  { %2663 = vmatpush3.bf16.msra.mxu0 %v2804_v1  ;;  %v2821_v19 = vld [vmem:[%s3765_s0 + $0x60] sm:$0xff]  }
   0x8   :  { %2664 = vmatprep.subr.bf16.mxu0 %v2805_v3 }
   0xb   :  { %2665 = vmatpush3.bf16.msra.mxu0 %v2805_v3 }
   0xc   :  { %2666 = vmatprep.subr.bf16.mxu0 %v2806_v5 }
   0xf   :  { %2667 = vmatpush3.bf16.msra.mxu0 %v2806_v5 }
  0x10   :  { %2668 = vmatprep.subr.bf16.mxu0 %v2807_v6 }
  0x13   :  { %2669 = vmatpush3.bf16.msra.mxu0 %v2807_v6 }
  0x14   :  { %2670 = vmatprep.subr.bf16.mxu0 %v2808_v7 }
  0x17   :  { %2671 = vmatpush3.bf16.msra.mxu0 %v2808_v7 }
  0x1a   :  { %2673 = vmatmul.mubr.msk.bf16.vlgmr.msra.gmra.mxu0 %vm521_vm1, %v2810_v8 }
  0x1b   :  { %2676 = vmatprep.mubr.msk.bf16.mxu0 %vm521_vm1, %v2811_v9 }
  0x22   :  { %2677 = vmatmul.mubr.msk.bf16.gmra.mxu0 %vm521_vm1, %v2812_v10 }
  0x23   :  { %2680 = vmatprep.mubr.msk.bf16.mxu0 %vm521_vm1, %v2813_v11 }
  0x2a   :  { %2681 = vmatmul.mubr.msk.bf16.gmra.mxu0 %vm521_vm1, %v2814_v12 }
  0x2b   :  { %2684 = vmatprep.mubr.msk.bf16.mxu0 %vm521_vm1, %v2815_v13 }
  0x32   :  { %2685 = vmatmul.mubr.msk.bf16.gmra.mxu0 %vm521_vm1, %v2816_v14 }
  0x33   :  { %2688 = vmatprep.mubr.msk.bf16.mxu0 %vm521_vm1, %v2817_v15 }
  0x3a   :  { %2689 = vmatmul.mubr.msk.bf16.gmra.mxu0 %vm521_vm1, %v2818_v16 }
  0x3b   :  { %2692 = vmatprep.mubr.msk.bf16.mxu0 %vm521_vm1, %v2819_v17 }
  0x3c   :  { %10 = vsyncpa [#allocation3], 0  ;;  %v2822_v20 = vld [vmem:[%s3765_s0 + $0x68] sm:$0xff]   ;;  %v2823_v21 = vld [vmem:[%s3765_s0 + $0x70] sm:$0xff]   ;;  %vm1392_vm2 = vcmask 523264  }
  0x3d   :  { %v2824_v22 = vld [vmem:[%s3765_s0 + $0x78] sm:$0xff]   ;;  %v2825_v23 = vld [vmem:[%s3765_s0 + $0x80] sm:$0xff]   ;;  %v2826_v24 = vld [vmem:[%s3765_s0 + $0x88] sm:$0xff]  }
  0x3e   :  { %v2827_v25 = vld [vmem:[%s3765_s0 + $0x90] sm:$0xff]   ;;  %v2828_v26 = vld [vmem:[%s3765_s0 + $0x98] sm:$0xff]   ;;  %v2829_v27 = vld [vmem:[%s3765_s0 + $0xa0] sm:$0xff]  }
  0x3f   :  { %v2830_v28 = vld [vmem:[%s3765_s0 + $0xa8] sm:$0xff]   ;;  %v2831_v29 = vld [vmem:[%s3765_s0 + $0xb0] sm:$0xff]   ;;  %v2832_v30 = vld [vmem:[%s3765_s0 + $0xb8] sm:$0xff]  }
  0x40   :  { %v2833_v31 = vld [vmem:[%s3765_s0 + $0xc0] sm:$0xff]   ;;  %v2834_v32 = vld [vmem:[%s3765_s0 + $0xc8] sm:$0xff]   ;;  %v2835_v33 = vld [vmem:[%s3765_s0 + $0xd0] sm:$0xff]  }
  0x41   :  { %v2836_v34 = vld [vmem:[%s3765_s0 + $0xd8] sm:$0xff]   ;;  %v2837_v35 = vld [vmem:[%s3765_s0 + $0xe0] sm:$0xff]   ;;  %v2838_v36 = vld [vmem:[%s3765_s0 + $0xe8] sm:$0xff]  }
  0x42   :  { %2693 = vmatmul.mubr.msk.bf16.gmra.mxu0 %vm521_vm1, %v2820_v18  ;;  %v2839_v37 = vld [vmem:[%s3765_s0 + $0xf0] sm:$0xff]   ;;  %v2840_v38 = vld [vmem:[%s3765_s0 + $0xf8] sm:$0xff]   ;;  %v2841_v39 = vld [vmem:[%s3765_s0 + $0x100] sm:$0xff]  }
  0x43   :  { %2696 = vmatprep.mubr.msk.bf16.mxu0 %vm521_vm1, %v2821_v19  ;;  %v2842_v40 = vld [vmem:[%s3765_s0 + $0x108] sm:$0xff]   ;;  %v2843_v41 = vld [vmem:[%s3765_s0 + $0x110] sm:$0xff]   ;;  %v2844_v42 = vld [vmem:[%s3765_s0 + $0x118] sm:$0xff]  }
  0x44   :  { %v2845_v43 = vld [vmem:[%s3765_s0 + $0x120] sm:$0xff]   ;;  %v2846_v44 = vld [vmem:[%s3765_s0 + $0x128] sm:$0xff]   ;;  %v2847_v45 = vld [vmem:[%s3765_s0 + $0x130] sm:$0xff]  }
  0x45   :  { %v2848_v46 = vld [vmem:[%s3765_s0 + $0x138] sm:$0xff]   ;;  %v2849_v47 = vld [vmem:[%s3765_s0 + $0x140] sm:$0xff]   ;;  %v2850_v48 = vld [vmem:[%s3765_s0 + $0x148] sm:$0xff]  }
  0x46   :  { %v2851_v49 = vld [vmem:[%s3765_s0 + $0x150] sm:$0xff]   ;;  %v2852_v50 = vld [vmem:[%s3765_s0 + $0x158] sm:$0xff]   ;;  %v2853_v51 = vld [vmem:[%s3765_s0 + $0x160] sm:$0xff]  }
  0x47   :  { %v2854_v52 = vld [vmem:[%s3765_s0 + $0x168] sm:$0xff]   ;;  %v2855_v53 = vld [vmem:[%s3765_s0 + $0x170] sm:$0xff]   ;;  %v2856_v54 = vld [vmem:[%s3765_s0 + $0x178] sm:$0xff]  }
  0x48   :  { %v2857_v55 = vld [vmem:[%s3765_s0 + $0x180] sm:$0xff]   ;;  %v2858_v56 = vld [vmem:[%s3765_s0 + $0x188] sm:$0xff]   ;;  %v2859_v57 = vld [vmem:[%s3765_s0 + $0x190] sm:$0xff]  }
  0x49   :  { %v3151_v58 = vld [vmem:[%s3769_s4] sm:$0xff]  ;;  %v2860_v62 = vld [vmem:[%s3765_s0 + $0x198] sm:$0xff]   ;;  %v2862_v4 = vld [vmem:[%s3765_s0 + $0x1a8] sm:$0xff]  }
  0x4a   :  { %2697 = vmatmul.mubr.msk.bf16.gmra.mxu0 %vm521_vm1, %v2822_v20  ;;  %2556 = vmatprep.mubr.msk.f32.mxu1 %vm1392_vm2, %v3151_v58  ;;  %v2861_v63 = vld [vmem:[%s3765_s0 + $0x1a0] sm:$0xff]   ;;  %v2863_v5 = vld [vmem:[%s3765_s0 + $0x1b0] sm:$0xff]   ;;  %v2864_v10 = vld [vmem:[%s3765_s0 + $0x1b8] sm:$0xff]  }
  0x4b   :  { %2700 = vmatprep.mubr.msk.bf16.mxu0 %vm521_vm1, %v2823_v21  ;;  %v2865_v11 = vld [vmem:[%s3765_s0 + $0x1c0] sm:$0xff]   ;;  %v2866_v16 = vld [vmem:[%s3765_s0 + $0x1c8] sm:$0xff]   ;;  %v2867_v17 = vld [vmem:[%s3765_s0 + $0x1d0] sm:$0xff]  }
  0x52   :  { %2701 = vmatmul.mubr.msk.bf16.gmra.mxu0 %vm521_vm1, %v2824_v22  ;;  %v2868_v22 = vld [vmem:[%s3765_s0 + $0x1d8] sm:$0xff]  }
  0x53   :  { %2704 = vmatprep.mubr.msk.bf16.mxu0 %vm521_vm1, %v2825_v23  ;;  %v2869_v23 = vld [vmem:[%s3765_s0 + $0x1e0] sm:$0xff]  }
  0x5a   :  { %2705 = vmatmul.mubr.msk.bf16.gmra.mxu0 %vm521_vm1, %v2826_v24 }
  0x5b   :  { %2708 = vmatprep.mubr.msk.bf16.mxu0 %vm521_vm1, %v2827_v25 }
  0x62   :  { %2709 = vmatmul.mubr.msk.bf16.gmra.mxu0 %vm521_vm1, %v2828_v26 }
  0x63   :  { %2712 = vmatprep.mubr.msk.bf16.mxu0 %vm521_vm1, %v2829_v27 }
  0x6a   :  { %2713 = vmatmul.mubr.msk.bf16.gmra.mxu0 %vm521_vm1, %v2830_v28  ;;  %v2870_v28 = vld [vmem:[%s3765_s0 + $0x1e8] sm:$0xff]  }
  0x6b   :  { %2716 = vmatprep.mubr.msk.bf16.mxu0 %vm521_vm1, %v2831_v29  ;;  %v2871_v29 = vld [vmem:[%s3765_s0 + $0x1f0] sm:$0xff]  }
  0x72   :  { %2717 = vmatmul.mubr.msk.bf16.gmra.mxu0 %vm521_vm1, %v2832_v30 }
  0x73   :  { %2720 = vmatprep.mubr.msk.bf16.mxu0 %vm521_vm1, %v2833_v31 }
  0x7a   :  { %2721 = vmatmul.mubr.msk.bf16.gmra.mxu0 %vm521_vm1, %v2834_v32 }
  0x7b   :  { %2724 = vmatprep.mubr.msk.bf16.mxu0 %vm521_vm1, %v2835_v33 }
  0x82   :  { %2725 = vmatmul.mubr.msk.bf16.gmra.mxu0 %vm521_vm1, %v2836_v34  ;;  %v2872_v34 = vld [vmem:[%s3765_s0 + $0x1f8] sm:$0xff]  }
  0x83   :  { %2728 = vmatprep.mubr.msk.bf16.mxu0 %vm521_vm1, %v2837_v35 }
  0x8a   :  { %2729 = vmatmul.mubr.msk.bf16.gmra.mxu0 %vm521_vm1, %v2838_v36 }
  0x8b   :  { %2732 = vmatprep.mubr.msk.bf16.mxu0 %vm521_vm1, %v2839_v37 }
  0x92   :  { %2733 = vmatmul.mubr.msk.bf16.gmra.mxu0 %vm521_vm1, %v2840_v38  ;;  %v3252_v38 = vld [vmem:[%s3768_s3] ss:$0 sm:$0xff] }
  0x93   :  { %2736 = vmatprep.mubr.msk.bf16.mxu0 %vm521_vm1, %v2841_v39 }
  0x9a   :  { %2737 = vmatmul.mubr.msk.bf16.gmra.mxu0 %vm521_vm1, %v2842_v40 }
  0x9b   :  { %2740 = vmatprep.mubr.msk.bf16.mxu0 %vm521_vm1, %v2843_v41 }
  0xa2   :  { %2741 = vmatmul.mubr.msk.bf16.gmra.mxu0 %vm521_vm1, %v2844_v42 }
  0xa3   :  { %2744 = vmatprep.mubr.msk.bf16.mxu0 %vm521_vm1, %v2845_v43 }
  0xaa   :  { %2745 = vmatmul.mubr.msk.bf16.gmra.mxu0 %vm521_vm1, %v2846_v44 }
  0xab   :  { %2748 = vmatprep.mubr.msk.bf16.mxu0 %vm521_vm1, %v2847_v45 }
  0xb2   :  { %2749 = vmatmul.mubr.msk.bf16.gmra.mxu0 %vm521_vm1, %v2848_v46 }
  0xb3   :  { %2752 = vmatprep.mubr.msk.bf16.mxu0 %vm521_vm1, %v2849_v47 }
  0xba   :  { %2753 = vmatmul.mubr.msk.bf16.gmra.mxu0 %vm521_vm1, %v2850_v48 }
  0xbb   :  { %2756 = vmatprep.mubr.msk.bf16.mxu0 %vm521_vm1, %v2851_v49 }
  0xc2   :  { %2757 = vmatmul.mubr.msk.bf16.gmra.mxu0 %vm521_vm1, %v2852_v50 }
  0xc3   :  { %2760 = vmatprep.mubr.msk.bf16.mxu0 %vm521_vm1, %v2853_v51 }
  0xca   :  { %2761 = vmatmul.mubr.msk.bf16.gmra.mxu0 %vm521_vm1, %v2854_v52 }
  0xcb   :  { %2764 = vmatprep.mubr.msk.bf16.mxu0 %vm521_vm1, %v2855_v53 }
  0xd2   :  { %2765 = vmatmul.mubr.msk.bf16.gmra.mxu0 %vm521_vm1, %v2856_v54 }
  0xd3   :  { %2768 = vmatprep.mubr.msk.bf16.mxu0 %vm521_vm1, %v2857_v55 }
  0xda   :  { %v3153_v59 = vpop.f32.mrf.mxu0  ;;  %2769 = vmatmul.mubr.msk.bf16.gmra.mxu0 %vm521_vm1, %v2858_v56 }
  0xdb   :  { %2772 = vmatprep.mubr.msk.bf16.mxu0 %vm521_vm1, %v2859_v57 }
  0xdc   :  { %v3159_v60 = vpop.f32.mrf.mxu0 }
  0xde   :  { %v3161_v61 = vpop.f32.mrf.mxu0 }
  0xe0   :  { %v3169_v0 = vpop.f32.mrf.mxu0 }
  0xe2   :  { %v3171_v1 = vpop.f32.mrf.mxu0  ;;  %2773 = vmatmul.mubr.msk.bf16.gmra.mxu0 %vm521_vm1, %v2860_v62 }
  0xe3   :  { %2776 = vmatprep.mubr.msk.bf16.mxu0 %vm521_vm1, %v2861_v63 }
  0xe4   :  { %v3175_v2 = vpop.f32.mrf.mxu0 }
  0xe6   :  { %v3177_v3 = vpop.f32.mrf.mxu0 }
  0xe8   :  { %v3185_v6 = vpop.f32.mrf.mxu0 }
  0xea   :  { %v3187_v7 = vpop.f32.mrf.mxu0  ;;  %2777 = vmatmul.mubr.msk.bf16.gmra.mxu0 %vm521_vm1, %v2862_v4 }
  0xeb   :  { %2780 = vmatprep.mubr.msk.bf16.mxu0 %vm521_vm1, %v2863_v5 }
  0xec   :  { %v3191_v8 = vpop.f32.mrf.mxu0 }
  0xee   :  { %v3193_v9 = vpop.f32.mrf.mxu0 }
  0xf0   :  { %v3201_v12 = vpop.f32.mrf.mxu0 }
  0xf2   :  { %v2686_v13 = vpop.f32.mrf.mxu0  ;;  %2781 = vmatmul.mubr.msk.bf16.gmra.mxu0 %vm521_vm1, %v2864_v10 }
  0xf3   :  { %2784 = vmatprep.mubr.msk.bf16.mxu0 %vm521_vm1, %v2865_v11  ;;  %v809_v45 = vadd.f32 %v2686_v13, %v3252_v38  ;;  %v796_v11 = vadd.f32 %v3193_v9, %v3252_v38 }
  0xf4   :  { %v800_v14 = vpop.f32.mrf.mxu0 }
  0xf5   :  { %v1277_v51 = vmax.f32 %v809_v45, 0.0  ;;  %v801_v57 = vadd.f32 %v3252_v38, %v800_v14 }
  0xf6   :  { %v2687_v15 = vpop.f32.mrf.mxu0 }
  0xf7   :  { %v812_v39 = vadd.f32 %v2687_v15, %v3252_v38  ;;  %v1275_v13 = vmax.f32 %v801_v57, 0.0 }
  0xf8   :  { %v803_v18 = vpop.f32.mrf.mxu0 }
  0xf9   :  { %v1278_v46 = vmax.f32 %v812_v39, 0.0  ;;  %v804_v52 = vadd.f32 %v3252_v38, %v803_v18  ;;  %v793_v18 = vadd.f32 %v3187_v7, %v3252_v38 }
  0xfa   :  { %v3211_v19 = vpop.f32.mrf.mxu0  ;;  %2785 = vmatmul.mubr.msk.bf16.gmra.mxu0 %vm521_vm1, %v2866_v16 }
  0xfb   :  { %2788 = vmatprep.mubr.msk.bf16.mxu0 %vm521_vm1, %v2867_v17  ;;  %v1276_v62 = vmax.f32 %v804_v52, 0.0 }
  0xfc   :  { %v3215_v20 = vpop.f32.mrf.mxu0 }
  0xfe   :  { %v3217_v21 = vpop.f32.mrf.mxu0 }
 0x100   :  { %v3225_v24 = vpop.f32.mrf.mxu0 }
 0x102   :  { %v3227_v25 = vpop.f32.mrf.mxu0  ;;  %2789 = vmatmul.mubr.msk.bf16.gmra.mxu0 %vm521_vm1, %v2868_v22  ;;  %v1274_v22 = vmax.f32 %v796_v11, 0.0 }
 0x103   :  { %2792 = vmatprep.mubr.msk.bf16.mxu0 %vm521_vm1, %v2869_v23 }
 0x104   :  { %v3231_v26 = vpop.f32.mrf.mxu0 }
 0x106   :  { %v3233_v27 = vpop.f32.mrf.mxu0 }
 0x108   :  { %v3241_v30 = vpop.f32.mrf.mxu0 }
 0x10a   :  { %v2698_v31 = vpop.f32.mrf.mxu0  ;;  %2793 = vmatmul.mubr.msk.bf16.gmra.mxu0 %vm521_vm1, %v2870_v28 }
 0x10b   :  { %2796 = vmatprep.mubr.msk.bf16.mxu0 %vm521_vm1, %v2871_v29  ;;  %v857_v14 = vadd.f32 %v2698_v31, %v3252_v38  ;;  %v1273_v31 = vmax.f32 %v793_v18, 0.0 }
 0x10c   :  { %v848_v32 = vpop.f32.mrf.mxu0 }
 0x10d   :  { %v1289_v28 = vmax.f32 %v857_v14, 0.0  ;;  %v849_v7 = vadd.f32 %v3252_v38, %v848_v32  ;;  %v780_v32 = vadd.f32 %v3177_v3, %v3252_v38  ;;  %v836_v3 = vadd.f32 %v3252_v38, %v3241_v30 }
 0x10e   :  { %v2699_v33 = vpop.f32.mrf.mxu0  ;;  %v769_v30 = vadd.f32 %v3252_v38, %v3175_v2  ;;  %v825_v2 = vadd.f32 %v3211_v19, %v3252_v38 }
 0x10f   :  { %v860_v4 = vadd.f32 %v2699_v33, %v3252_v38  ;;  %v788_v33 = vadd.f32 %v3252_v38, %v3201_v12  ;;  %v844_v12 = vadd.f32 %v3233_v27, %v3252_v38  ;;  %v777_v27 = vadd.f32 %v3171_v1, %v3252_v38 }
 0x110   :  { %v851_v35 = vpop.f32.mrf.mxu0  ;;  %v833_v1 = vadd.f32 %v3252_v38, %v3231_v26  ;;  %v1284_v57 = vmax.f32 %v836_v3, 0.0  ;;  %v764_v26 = vadd.f32 %v3161_v61, %v3252_v38  ;;  %v1267_v14 = vmax.f32 %v769_v30, 0.0 }
 0x111   :  { %v1290_v16 = vmax.f32 %v860_v4, 0.0  ;;  %v852_v9 = vadd.f32 %v3252_v38, %v851_v35  ;;  %v785_v35 = vadd.f32 %v3252_v38, %v3191_v8  ;;  %v1272_v39 = vmax.f32 %v788_v33, 0.0 }
 0x112   :  { %v2702_v36 = vpop.f32.mrf.mxu0  ;;  %2797 = vmatmul.mubr.msk.bf16.gmra.mxu0 %vm521_vm1, %v2872_v34  ;;  %v841_v8 = vadd.f32 %v3227_v25, %v3252_v38  ;;  %v1286_v45 = vmax.f32 %v844_v12, 0.0  ;;  %v1269_v25 = vmax.f32 %v777_v27, 0.0  ;;  %v1283_v11 = vmax.f32 %v833_v1, 0.0 }
 0x113   :  { %v873_v41 = vadd.f32 %v2702_v36, %v3252_v38  ;;  %v1288_v36 = vmax.f32 %v852_v9, 0.0  ;;  %v820_v61 = vadd.f32 %v3252_v38, %v3225_v24  ;;  %v753_v24 = vadd.f32 %v3252_v38, %v3159_v60 }
 0x114   :  { %v864_v37 = vpop.f32.mrf.mxu0 }
 0x115   :  { %v1293_v48 = vmax.f32 %v873_v41, 0.0  ;;  %v865_v54 = vadd.f32 %v3252_v38, %v864_v37  ;;  %v1287_v41 = vmax.f32 %v849_v7, 0.0  ;;  %v756_v7 = vadd.f32 %v3252_v38, %v3169_v0 }
 0x116   :  { %v2703_v40 = vpop.f32.mrf.mxu0  ;;  %v1263_v0 = vmax.f32 %v753_v24, 0.0 }
 0x117   :  { %v876_v42 = vadd.f32 %v2703_v40, %v3252_v38  ;;  %v1291_v5 = vmax.f32 %v865_v54, 0.0  ;;  %v772_v54 = vadd.f32 %v3252_v38, %v3185_v6  ;;  %v828_v6 = vadd.f32 %v3217_v21, %v3252_v38 }
 0x118   :  { %v867_v43 = vpop.f32.mrf.mxu0  ;;  %v761_v21 = vadd.f32 %v3153_v59, %v3252_v38  ;;  %v817_v59 = vadd.f32 %v3252_v38, %v3215_v20  ;;  %v1264_v12 = vmax.f32 %v756_v7, 0.0 }
 0x119   :  { %v1294_v44 = vmax.f32 %v876_v42, 0.0  ;;  %v868_v49 = vadd.f32 %v3252_v38, %v867_v43  ;;  %v1271_v43 = vmax.f32 %v785_v35, 0.0  ;;  %v1268_v4 = vmax.f32 %v772_v54, 0.0 }
 0x11a   :  { %v3258_v47 = vpop.f32.mrf.mxu0  ;;  %v1282_v18 = vmax.f32 %v828_v6, 0.0  ;;  %v1265_v19 = vmax.f32 %v761_v21, 0.0  ;;  %v1280_v35 = vmax.f32 %v820_v61, 0.0 }
 0x11b   :  { %2524 = vmatprep.subr.msk.mxu1 %vm1392_vm2, %v1294_v44  ;;  %v1292_v55 = vmax.f32 %v868_v49, 0.0 }
 0x11c   :  { %v3262_v50 = vpop.f32.mrf.mxu0  ;;  %2525 = vmatpush3.xpose.msk.msra.mxu1 %vm1392_vm2, %v1278_v46 }
 0x11d   :  { %2526 = vmatprep.subr.msk.mxu1 %vm1392_vm2, %v1293_v48  ;;  %v1270_v48 = vmax.f32 %v780_v32, 0.0  ;;  %v1279_v32 = vmax.f32 %v817_v59, 0.0 }
 0x11e   :  { %v3267_v53 = vpop.f32.mrf.mxu0 }
 0x120   :  { %v3270_v56 = vpop.f32.mrf.mxu0  ;;  %2527 = vmatpush3.xpose.msk.msra.mxu1 %vm1392_vm2, %v1277_v51  ;;  %v1285_v51 = vmax.f32 %v841_v8, 0.0 }
 0x121   :  { %2528 = vmatprep.subr.msk.mxu1 %vm1392_vm2, %v1292_v55 }
 0x122   :  { %v3275_v63 = vpop.f32.mrf.mxu0 }
 0x124   :  { %v3278_v10 = vpop.f32.mrf.mxu0  ;;  %2529 = vmatpush3.xpose.msk.msra.mxu1 %vm1392_vm2, %v1276_v62 }
 0x125   :  { %2530 = vmatprep.subr.msk.mxu1 %vm1392_vm2, %v1291_v5 }
 0x126   :  { %v3284_v15 = vpop.f32.mrf.mxu0 }
 0x128   :  { %v3287_v17 = vpop.f32.mrf.mxu0  ;;  %2531 = vmatpush3.xpose.msk.msra.mxu1 %vm1392_vm2, %v1275_v13 }
 0x129   :  { %2532 = vmatprep.subr.msk.mxu1 %vm1392_vm2, %v1290_v16 }
 0x12a   :  { %v3293_v23 = vpop.f32.mrf.mxu0 }
 0x12c   :  { %v3296_v29 = vpop.f32.mrf.mxu0  ;;  %2533 = vmatpush3.xpose.msk.msra.mxu1 %vm1392_vm2, %v1274_v22 }
 0x12d   :  { %2534 = vmatprep.subr.msk.mxu1 %vm1392_vm2, %v1289_v28  ;;  %v1266_v28 = vmax.f32 %v764_v26, 0.0 }
 0x12e   :  { %v3302_v34 = vpop.f32.mrf.mxu0 }
 0x130   :  { %v3305_v37 = vpop.f32.mrf.mxu0  ;;  %2535 = vmatpush3.xpose.msk.msra.mxu1 %vm1392_vm2, %v1273_v31  ;;  %v1281_v31 = vmax.f32 %v825_v2, 0.0 }
 0x131   :  { %2536 = vmatprep.subr.msk.mxu1 %vm1392_vm2, %v1288_v36 }
 0x132   :  { %v3311_v40 = vpop.f32.mrf.mxu0 }
 0x134   :  { %v3315_v42 = vpop.f32.mrf.mxu0  ;;  %2537 = vmatpush3.xpose.msk.msra.mxu1 %vm1392_vm2, %v1272_v39 }
 0x135   :  { %2538 = vmatprep.subr.msk.mxu1 %vm1392_vm2, %v1287_v41  ;;  %v929_v26 = vadd.f32 %v3252_v38, %v3315_v42 }
 0x136   :  { %v2719_v44 = vpop.f32.mrf.mxu0 }
 0x137   :  { %v940_v20 = vadd.f32 %v2719_v44, %v3252_v38 }
 0x138   :  { %v3323_v46 = vpop.f32.mrf.mxu0  ;;  %2539 = vmatpush3.xpose.msk.msra.mxu1 %vm1392_vm2, %v1271_v43 }
 0x139   :  { %2540 = vmatprep.subr.msk.mxu1 %vm1392_vm2, %v1286_v45  ;;  %v1310_v3 = vmax.f32 %v940_v20, 0.0 }
 0x13a   :  { %v3329_v49 = vpop.f32.mrf.mxu0 }
 0x13c   :  { %v3333_v52 = vpop.f32.mrf.mxu0  ;;  %2541 = vmatpush3.xpose.msk.msra.mxu1 %vm1392_vm2, %v1270_v48 }
 0x13d   :  { %2542 = vmatprep.subr.msk.mxu1 %vm1392_vm2, %v1285_v51  ;;  %v937_v51 = vadd.f32 %v3311_v40, %v3252_v38 }
 0x13e   :  { %v3339_v55 = vpop.f32.mrf.mxu0 }
 0x13f   :  { %v1309_v40 = vmax.f32 %v937_v51, 0.0 }
 0x140   :  { %v3343_v62 = vpop.f32.mrf.mxu0  ;;  %2543 = vmatpush3.xpose.msk.msra.mxu1 %vm1392_vm2, %v1269_v25 }
 0x141   :  { %2544 = vmatprep.subr.msk.mxu1 %vm1392_vm2, %v1284_v57  ;;  %v932_v57 = vadd.f32 %v3252_v38, %v3323_v46 }
 0x142   :  { %v3349_v5 = vpop.f32.mrf.mxu0 }
 0x144   :  { %v3353_v13 = vpop.f32.mrf.mxu0  ;;  %2545 = vmatpush3.xpose.msk.msra.mxu1 %vm1392_vm2, %v1268_v4 }
 0x145   :  { %2546 = vmatprep.subr.msk.mxu1 %vm1392_vm2, %v1283_v11 }
 0x146   :  { %v3359_v16 = vpop.f32.mrf.mxu0 }
 0x148   :  { %v3363_v22 = vpop.f32.mrf.mxu0  ;;  %2547 = vmatpush3.xpose.msk.msra.mxu1 %vm1392_vm2, %v1267_v14  ;;  %v1308_v14 = vmax.f32 %v932_v57, 0.0 }
 0x149   :  { %2548 = vmatprep.subr.msk.mxu1 %vm1392_vm2, %v1282_v18 }
 0x14a   :  { %v2730_v9 = vpop.f32.mrf.mxu0 }
 0x14b   :  { %v985_v42 = vadd.f32 %v2730_v9, %v3252_v38 }
 0x14c   :  { %v3371_v33 = vpop.f32.mrf.mxu0  ;;  %2549 = vmatpush3.xpose.msk.msra.mxu1 %vm1392_vm2, %v1266_v28  ;;  %v924_v28 = vadd.f32 %v3302_v34, %v3252_v38 }
 0x14d   :  { %2550 = vmatprep.subr.msk.mxu1 %vm1392_vm2, %v1281_v31  ;;  %v1307_v31 = vmax.f32 %v929_v26, 0.0  ;;  %v1321_v24 = vmax.f32 %v985_v42, 0.0 }
 0x14e   :  { %v2731_v36 = vpop.f32.mrf.mxu0  ;;  %v1306_v59 = vmax.f32 %v924_v28, 0.0 }
 0x14f   :  { %v988_v18 = vadd.f32 %v2731_v36, %v3252_v38  ;;  %v921_v36 = vadd.f32 %v3293_v23, %v3252_v38  ;;  %v977_v23 = vadd.f32 %v3252_v38, %v3371_v33  ;;  %v908_v33 = vadd.f32 %v3284_v15, %v3252_v38 }
 0x150   :  { %v979_v39 = vpop.f32.mrf.mxu0  ;;  %2551 = vmatpush3.xpose.msk.msra.mxu1 %vm1392_vm2, %v1265_v19  ;;  %v964_v15 = vadd.f32 %v3252_v38, %v3363_v22  ;;  %v897_v22 = vadd.f32 %v3252_v38, %v3278_v10  ;;  %v953_v10 = vadd.f32 %v3329_v49, %v3252_v38 }
 0x151   :  { %2552 = vmatprep.subr.msk.mxu1 %vm1392_vm2, %v1280_v35  ;;  %v1322_v19 = vmax.f32 %v988_v18, 0.0  ;;  %v980_v34 = vadd.f32 %v3252_v38, %v979_v39  ;;  %v1305_v9 = vmax.f32 %v921_v36, 0.0  ;;  %v913_v39 = vadd.f32 %v3252_v38, %v3296_v29 }
 0x152   :  { %v2734_v41 = vpop.f32.mrf.mxu0  ;;  %v969_v29 = vadd.f32 %v3349_v5, %v3252_v38  ;;  %v1316_v26 = vmax.f32 %v964_v15, 0.0  ;;  %v1299_v42 = vmax.f32 %v897_v22, 0.0 }
 0x153   :  { %v1001_v45 = vadd.f32 %v2734_v41, %v3252_v38  ;;  %v916_v41 = vadd.f32 %v3252_v38, %v3305_v37  ;;  %v972_v37 = vadd.f32 %v3359_v16, %v3252_v38  ;;  %v905_v16 = vadd.f32 %v3275_v63, %v3252_v38 }
 0x154   :  { %v992_v43 = vpop.f32.mrf.mxu0  ;;  %2553 = vmatpush3.xpose.msk.msra.mxu1 %vm1392_vm2, %v1264_v12  ;;  %v961_v63 = vadd.f32 %v3252_v38, %v3353_v13  ;;  %v892_v13 = vadd.f32 %v3267_v53, %v3252_v38  ;;  %v948_v53 = vadd.f32 %v3252_v38, %v3343_v62  ;;  %v881_v62 = vadd.f32 %v3252_v38, %v3262_v50 }
 0x155   :  { %2554 = vmatprep.subr.msk.mxu1 %vm1392_vm2, %v1279_v32  ;;  %v1325_v54 = vmax.f32 %v1001_v45, 0.0  ;;  %v993_v4 = vadd.f32 %v3252_v38, %v992_v43  ;;  %v1320_v43 = vmax.f32 %v980_v34, 0.0  ;;  %v1304_v20 = vmax.f32 %v916_v41, 0.0 }
 0x156   :  { %v2735_v8 = vpop.f32.mrf.mxu0  ;;  %v1319_v45 = vmax.f32 %v977_v23, 0.0  ;;  %v1318_v51 = vmax.f32 %v972_v37, 0.0  ;;  %v1301_v5 = vmax.f32 %v905_v16, 0.0  ;;  %v1315_v28 = vmax.f32 %v961_v63, 0.0 }
 0x157   :  { %v1004_v27 = vadd.f32 %v2735_v8, %v3252_v38  ;;  %v1323_v46 = vmax.f32 %v993_v4, 0.0  ;;  %v900_v4 = vadd.f32 %v3252_v38, %v3287_v17  ;;  %v956_v17 = vadd.f32 %v3339_v55, %v3252_v38 }
 0x158   :  { %v995_v48 = vpop.f32.mrf.mxu0  ;;  %2555 = vmatpush3.xpose.msk.msra.mxu1 %vm1392_vm2, %v1263_v0  ;;  %v889_v55 = vadd.f32 %v3258_v47, %v3252_v38  ;;  %v884_v23 = vadd.f32 %v3252_v38, %v3270_v56  ;;  %v945_v47 = vadd.f32 %v3252_v38, %v3333_v52  ;;  %v1295_v56 = vmax.f32 %v881_v62, 0.0 }
 0x159   :  { %v1326_v60 = vmax.f32 %v1004_v27, 0.0  ;;  %v996_v1 = vadd.f32 %v3252_v38, %v995_v48  ;;  %v1303_v48 = vmax.f32 %v913_v39, 0.0  ;;  %v1300_v18 = vmax.f32 %v900_v4, 0.0 }
 0x15a   :  { %v3391_v25 = vpop.f32.mrf.mxu0  ;;  %v1314_v36 = vmax.f32 %v956_v17, 0.0  ;;  %v1297_v49 = vmax.f32 %v889_v55, 0.0  ;;  %v1312_v39 = vmax.f32 %v948_v53, 0.0  ;;  %v1296_v37 = vmax.f32 %v884_v23, 0.0 }
 0x15b   :  { %2557 = vmatmul.mubr.msk.f32.vlgmr.msra.gmra.mxu1 %vm1392_vm2, %v3151_v58  ;;  %2558 = vmatprep.subr.msk.mxu1 %vm1392_vm2, %v1326_v60  ;;  %v1324_v6 = vmax.f32 %v996_v1, 0.0 }
 0x15c   :  { %v3397_v44 = vpop.f32.mrf.mxu0  ;;  %2559 = vmatpush3.xpose.msk.msra.mxu1 %vm1392_vm2, %v1310_v3  ;;  %2590 = vmatprep.mubr.msk.f32.mxu1 %vm1392_vm2, %v3151_v58 }
 0x15d   :  { %2560 = vmatprep.subr.msk.mxu1 %vm1392_vm2, %v1325_v54  ;;  %v1302_v54 = vmax.f32 %v908_v33, 0.0  ;;  %v1311_v33 = vmax.f32 %v945_v47, 0.0 }
 0x15e   :  { %v3405_v30 = vpop.f32.mrf.mxu0 }
 0x160   :  { %v3408_v11 = vpop.f32.mrf.mxu0  ;;  %2561 = vmatpush3.xpose.msk.msra.mxu1 %vm1392_vm2, %v1309_v40  ;;  %v1317_v40 = vmax.f32 %v969_v29, 0.0 }
 0x161   :  { %2562 = vmatprep.subr.msk.mxu1 %vm1392_vm2, %v1324_v6 }
 0x162   :  { %v3414_v2 = vpop.f32.mrf.mxu0 }
 0x164   :  { %v3417_v21 = vpop.f32.mrf.mxu0  ;;  %2563 = vmatpush3.xpose.msk.msra.mxu1 %vm1392_vm2, %v1308_v14 }
 0x165   :  { %2564 = vmatprep.subr.msk.mxu1 %vm1392_vm2, %v1323_v46 }
 0x166   :  { %v3423_v61 = vpop.f32.mrf.mxu0 }
 0x168   :  { %v3426_v7 = vpop.f32.mrf.mxu0  ;;  %2565 = vmatpush3.xpose.msk.msra.mxu1 %vm1392_vm2, %v1307_v31 }
 0x169   :  { %2566 = vmatprep.subr.msk.mxu1 %vm1392_vm2, %v1322_v19 }
 0x16a   :  { %v3432_v35 = vpop.f32.mrf.mxu0 }
 0x16c   :  { %v3435_v12 = vpop.f32.mrf.mxu0  ;;  %2567 = vmatpush3.xpose.msk.msra.mxu1 %vm1392_vm2, %v1306_v59 }
 0x16d   :  { %2568 = vmatprep.subr.msk.mxu1 %vm1392_vm2, %v1321_v24  ;;  %v1298_v24 = vmax.f32 %v892_v13, 0.0 }
 0x16e   :  { %v3441_v32 = vpop.f32.mrf.mxu0 }
 0x170   :  { %v3445_v0 = vpop.f32.mrf.mxu0  ;;  %2569 = vmatpush3.xpose.msk.msra.mxu1 %vm1392_vm2, %v1305_v9  ;;  %v1313_v9 = vmax.f32 %v953_v10, 0.0 }
 0x171   :  { %2570 = vmatprep.subr.msk.mxu1 %vm1392_vm2, %v1320_v43 }
 0x172   :  { %v3451_v8 = vpop.f32.mrf.mxu0 }
 0x174   :  { %v3455_v27 = vpop.f32.mrf.mxu0  ;;  %2571 = vmatpush3.xpose.msk.msra.mxu1 %vm1392_vm2, %v1304_v20 }
 0x175   :  { %2572 = vmatprep.subr.msk.mxu1 %vm1392_vm2, %v1319_v45  ;;  %v1057_v13 = vadd.f32 %v3252_v38, %v3455_v27 }
 0x176   :  { %v2751_v60 = vpop.f32.mrf.mxu0 }
 0x177   :  { %v1068_v52 = vadd.f32 %v2751_v60, %v3252_v38 }
 0x178   :  { %v3463_v3 = vpop.f32.mrf.mxu0  ;;  %2573 = vmatpush3.xpose.msk.msra.mxu1 %vm1392_vm2, %v1303_v48 }
 0x179   :  { %2574 = vmatprep.subr.msk.mxu1 %vm1392_vm2, %v1318_v51  ;;  %v1342_v15 = vmax.f32 %v1068_v52, 0.0 }
 0x17a   :  { %v3469_v1 = vpop.f32.mrf.mxu0 }
 0x17c   :  { %v3473_v57 = vpop.f32.mrf.mxu0  ;;  %2575 = vmatpush3.xpose.msk.msra.mxu1 %vm1392_vm2, %v1302_v54 }
 0x17d   :  { %2576 = vmatprep.subr.msk.mxu1 %vm1392_vm2, %v1317_v40  ;;  %v1065_v40 = vadd.f32 %v3451_v8, %v3252_v38 }
 0x17e   :  { %v3479_v6 = vpop.f32.mrf.mxu0 }
 0x17f   :  { %v1341_v8 = vmax.f32 %v1065_v40, 0.0 }
 0x180   :  { %v3483_v14 = vpop.f32.mrf.mxu0  ;;  %2577 = vmatpush3.xpose.msk.msra.mxu1 %vm1392_vm2, %v1301_v5 }
 0x181   :  { %2578 = vmatprep.subr.msk.mxu1 %vm1392_vm2, %v1316_v26  ;;  %v1060_v26 = vadd.f32 %v3252_v38, %v3463_v3 }
 0x182   :  { %v3489_v46 = vpop.f32.mrf.mxu0 }
 0x184   :  { %v3493_v31 = vpop.f32.mrf.mxu0  ;;  %2579 = vmatpush3.xpose.msk.msra.mxu1 %vm1392_vm2, %v1300_v18 }
 0x185   :  { %2580 = vmatprep.subr.msk.mxu1 %vm1392_vm2, %v1315_v28 }
 0x186   :  { %v3499_v19 = vpop.f32.mrf.mxu0 }
 0x188   :  { %v3503_v59 = vpop.f32.mrf.mxu0  ;;  %2581 = vmatpush3.xpose.msk.msra.mxu1 %vm1392_vm2, %v1299_v42  ;;  %v1340_v42 = vmax.f32 %v1060_v26, 0.0 }
 0x189   :  { %2582 = vmatprep.subr.msk.mxu1 %vm1392_vm2, %v1314_v36 }
 0x18a   :  { %v2762_v34 = vpop.f32.mrf.mxu0 }
 0x18b   :  { %v1113_v27 = vadd.f32 %v2762_v34, %v3252_v38 }
 0x18c   :  { %v3511_v41 = vpop.f32.mrf.mxu0  ;;  %2583 = vmatpush3.xpose.msk.msra.mxu1 %vm1392_vm2, %v1298_v24  ;;  %v1052_v24 = vadd.f32 %v3441_v32, %v3252_v38 }
 0x18d   :  { %2584 = vmatprep.subr.msk.mxu1 %vm1392_vm2, %v1313_v9  ;;  %v1339_v9 = vmax.f32 %v1057_v13, 0.0  ;;  %v1353_v62 = vmax.f32 %v1113_v27, 0.0 }
 0x18e   :  { %v2763_v43 = vpop.f32.mrf.mxu0  ;;  %v1338_v47 = vmax.f32 %v1052_v24, 0.0 }
 0x18f   :  { %v1116_v36 = vadd.f32 %v2763_v43, %v3252_v38  ;;  %v1049_v43 = vadd.f32 %v3432_v35, %v3252_v38  ;;  %v1105_v35 = vadd.f32 %v3252_v38, %v3511_v41  ;;  %v1036_v41 = vadd.f32 %v3423_v61, %v3252_v38 }
 0x190   :  { %v1107_v20 = vpop.f32.mrf.mxu0  ;;  %2585 = vmatpush3.xpose.msk.msra.mxu1 %vm1392_vm2, %v1297_v49  ;;  %v1092_v61 = vadd.f32 %v3252_v38, %v3503_v59  ;;  %v1025_v59 = vadd.f32 %v3252_v38, %v3417_v21  ;;  %v1081_v21 = vadd.f32 %v3469_v1, %v3252_v38 }
 0x191   :  { %2586 = vmatprep.subr.msk.mxu1 %vm1392_vm2, %v1312_v39  ;;  %v1354_v49 = vmax.f32 %v1116_v36, 0.0  ;;  %v1108_v32 = vadd.f32 %v3252_v38, %v1107_v20  ;;  %v1337_v34 = vmax.f32 %v1049_v43, 0.0  ;;  %v1041_v20 = vadd.f32 %v3252_v38, %v3435_v12 }
 0x192   :  { %v2766_v45 = vpop.f32.mrf.mxu0  ;;  %v1097_v12 = vadd.f32 %v3489_v46, %v3252_v38  ;;  %v1348_v13 = vmax.f32 %v1092_v61, 0.0  ;;  %v1331_v27 = vmax.f32 %v1025_v59, 0.0 }
 0x193   :  { %v1129_v51 = vadd.f32 %v2766_v45, %v3252_v38  ;;  %v1044_v45 = vadd.f32 %v3252_v38, %v3445_v0  ;;  %v1100_v0 = vadd.f32 %v3499_v19, %v3252_v38  ;;  %v1033_v19 = vadd.f32 %v3414_v2, %v3252_v38 }
 0x194   :  { %v1120_v48 = vpop.f32.mrf.mxu0  ;;  %2587 = vmatpush3.xpose.msk.msra.mxu1 %vm1392_vm2, %v1296_v37  ;;  %v1089_v2 = vadd.f32 %v3252_v38, %v3493_v31  ;;  %v1020_v31 = vadd.f32 %v3405_v30, %v3252_v38  ;;  %v1076_v30 = vadd.f32 %v3252_v38, %v3483_v14  ;;  %v1009_v14 = vadd.f32 %v3252_v38, %v3397_v44 }
 0x195   :  { %2588 = vmatprep.subr.msk.mxu1 %vm1392_vm2, %v1311_v33  ;;  %v1357_v4 = vmax.f32 %v1129_v51, 0.0  ;;  %v1121_v18 = vadd.f32 %v3252_v38, %v1120_v48  ;;  %v1352_v48 = vmax.f32 %v1108_v32, 0.0  ;;  %v1336_v52 = vmax.f32 %v1044_v45, 0.0 }
 0x196   :  { %v2767_v29 = vpop.f32.mrf.mxu0  ;;  %v1351_v51 = vmax.f32 %v1105_v35, 0.0  ;;  %v1350_v40 = vmax.f32 %v1100_v0, 0.0  ;;  %v1333_v46 = vmax.f32 %v1033_v19, 0.0  ;;  %v1347_v24 = vmax.f32 %v1089_v2, 0.0 }
 0x197   :  { %v1132_v16 = vadd.f32 %v2767_v29, %v3252_v38  ;;  %v1355_v3 = vmax.f32 %v1121_v18, 0.0  ;;  %v1028_v18 = vadd.f32 %v3252_v38, %v3426_v7  ;;  %v1084_v7 = vadd.f32 %v3479_v6, %v3252_v38 }
 0x198   :  { %v1123_v54 = vpop.f32.mrf.mxu0  ;;  %2589 = vmatpush3.xpose.msk.msra.mxu1 %vm1392_vm2, %v1295_v56  ;;  %v1017_v6 = vadd.f32 %v3391_v25, %v3252_v38  ;;  %v1012_v35 = vadd.f32 %v3252_v38, %v3408_v11  ;;  %v1344_v25 = vmax.f32 %v1076_v30, 0.0  ;;  %v1327_v11 = vmax.f32 %v1009_v14, 0.0 }
 0x199   :  { %v1358_v50 = vmax.f32 %v1132_v16, 0.0  ;;  %v1124_v63 = vadd.f32 %v3252_v38, %v1123_v54  ;;  %v1335_v54 = vmax.f32 %v1041_v20, 0.0  ;;  %v1332_v36 = vmax.f32 %v1028_v18, 0.0 }
 0x19a   :  { %v3531_v5 = vpop.f32.mrf.mxu0  ;;  %v1346_v43 = vmax.f32 %v1084_v7, 0.0  ;;  %v1329_v1 = vmax.f32 %v1017_v6, 0.0  ;;  %v1073_v20 = vadd.f32 %v3252_v38, %v3473_v57  ;;  %v1328_v0 = vmax.f32 %v1012_v35, 0.0 }
 0x19b   :  { %2591 = vmatmul.mubr.msk.f32.vlgmr.msra.gmra.mxu1 %vm1392_vm2, %v3151_v58  ;;  %2592 = vmatprep.subr.msk.mxu1 %vm1392_vm2, %v1358_v50  ;;  %v1356_v17 = vmax.f32 %v1124_v63, 0.0 }
 0x19c   :  { %v3537_v60 = vpop.f32.mrf.mxu0  ;;  %2593 = vmatpush3.xpose.msk.msra.mxu1 %vm1392_vm2, %v1342_v15  ;;  %2624 = vmatprep.mubr.msk.f32.mxu1 %vm1392_vm2, %v3151_v58 }
 0x19d   :  { %2594 = vmatprep.subr.msk.mxu1 %vm1392_vm2, %v1357_v4  ;;  %v1334_v4 = vmax.f32 %v1036_v41, 0.0  ;;  %v1343_v41 = vmax.f32 %v1073_v20, 0.0 }
 0x19e   :  { %v3545_v22 = vpop.f32.mrf.mxu0 }
 0x1a0   :  { %v3548_v28 = vpop.f32.mrf.mxu0  ;;  %2595 = vmatpush3.xpose.msk.msra.mxu1 %vm1392_vm2, %v1341_v8  ;;  %v1349_v8 = vmax.f32 %v1097_v12, 0.0 }
 0x1a1   :  { %2596 = vmatprep.subr.msk.mxu1 %vm1392_vm2, %v1356_v17 }
 0x1a2   :  { %v3554_v10 = vpop.f32.mrf.mxu0 }
 0x1a4   :  { %v3557_v55 = vpop.f32.mrf.mxu0  ;;  %2597 = vmatpush3.xpose.msk.msra.mxu1 %vm1392_vm2, %v1340_v42 }
 0x1a5   :  { %2598 = vmatprep.subr.msk.mxu1 %vm1392_vm2, %v1355_v3 }
 0x1a6   :  { %v3563_v53 = vpop.f32.mrf.mxu0 }
 0x1a8   :  { %v3566_v23 = vpop.f32.mrf.mxu0  ;;  %2599 = vmatpush3.xpose.msk.msra.mxu1 %vm1392_vm2, %v1339_v9 }
 0x1a9   :  { %2600 = vmatprep.subr.msk.mxu1 %vm1392_vm2, %v1354_v49 }
 0x1aa   :  { %v3572_v39 = vpop.f32.mrf.mxu0 }
 0x1ac   :  { %v3575_v37 = vpop.f32.mrf.mxu0  ;;  %2601 = vmatpush3.xpose.msk.msra.mxu1 %vm1392_vm2, %v1338_v47 }
 0x1ad   :  { %2602 = vmatprep.subr.msk.mxu1 %vm1392_vm2, %v1353_v62  ;;  %v1330_v62 = vmax.f32 %v1020_v31, 0.0 }
 0x1ae   :  { %v3581_v33 = vpop.f32.mrf.mxu0 }
 0x1b0   :  { %v3585_v56 = vpop.f32.mrf.mxu0  ;;  %2603 = vmatpush3.xpose.msk.msra.mxu1 %vm1392_vm2, %v1337_v34  ;;  %v1345_v34 = vmax.f32 %v1081_v21, 0.0 }
 0x1b1   :  { %2604 = vmatprep.subr.msk.mxu1 %vm1392_vm2, %v1352_v48 }
 0x1b2   :  { %v3591_v29 = vpop.f32.mrf.mxu0 }
 0x1b4   :  { %v3595_v16 = vpop.f32.mrf.mxu0  ;;  %2605 = vmatpush3.xpose.msk.msra.mxu1 %vm1392_vm2, %v1336_v52 }
 0x1b5   :  { %2606 = vmatprep.subr.msk.mxu1 %vm1392_vm2, %v1351_v51  ;;  %v1185_v59 = vadd.f32 %v3252_v38, %v3595_v16  ;;  %v1177_v16 = vadd.f32 %v3572_v39, %v3252_v38  ;;  %v1169_v39 = vadd.f32 %v3252_v38, %v3575_v37  ;;  %v1161_v37 = vadd.f32 %v3554_v10, %v3252_v38 }
 0x1b6   :  { %v2783_v50 = vpop.f32.mrf.mxu0  ;;  %v1153_v10 = vadd.f32 %v3252_v38, %v3557_v55  ;;  %v1145_v55 = vadd.f32 %v3531_v5, %v3252_v38  ;;  %v1137_v5 = vadd.f32 %v3252_v38, %v3537_v60 }
 0x1b7   :  { %v1196_v57 = vadd.f32 %v2783_v50, %v3252_v38 }
 0x1b8   :  { %v3603_v15 = vpop.f32.mrf.mxu0  ;;  %2607 = vmatpush3.xpose.msk.msra.mxu1 %vm1392_vm2, %v1335_v54 }
 0x1b9   :  { %2608 = vmatprep.subr.msk.mxu1 %vm1392_vm2, %v1350_v40  ;;  %v1374_v61 = vmax.f32 %v1196_v57, 0.0 }
 0x1ba   :  { %v3609_v63 = vpop.f32.mrf.mxu0 }
 0x1bc   :  { %v3613_v26 = vpop.f32.mrf.mxu0  ;;  %2609 = vmatpush3.xpose.msk.msra.mxu1 %vm1392_vm2, %v1334_v4 }
 0x1bd   :  { %2610 = vmatprep.subr.msk.mxu1 %vm1392_vm2, %v1349_v8  ;;  %v1193_v8 = vadd.f32 %v3591_v29, %v3252_v38  ;;  %v1188_v29 = vadd.f32 %v3252_v38, %v3603_v15  ;;  %v1180_v15 = vadd.f32 %v3581_v33, %v3252_v38  ;;  %v1369_v33 = vmax.f32 %v1177_v16, 0.0 }
 0x1be   :  { %v3619_v17 = vpop.f32.mrf.mxu0 }
 0x1bf   :  { %v1373_v50 = vmax.f32 %v1193_v8, 0.0  ;;  %v1370_v21 = vmax.f32 %v1180_v15, 0.0  ;;  %v2066_v8 = vlaneseq }
 0x1c0   :  { %v3623_v42 = vpop.f32.mrf.mxu0  ;;  %2611 = vmatpush3.xpose.msk.msra.mxu1 %vm1392_vm2, %v1333_v46 }
 0x1c1   :  { %2612 = vmatprep.subr.msk.mxu1 %vm1392_vm2, %v1348_v13 }
 0x1c2   :  { %v3629_v3 = vpop.f32.mrf.mxu0 }
 0x1c4   :  { %v3633_v9 = vpop.f32.mrf.mxu0  ;;  %2613 = vmatpush3.xpose.msk.msra.mxu1 %vm1392_vm2, %v1332_v36  ;;  %v1372_v36 = vmax.f32 %v1188_v29, 0.0 }
 0x1c5   :  { %2614 = vmatprep.subr.msk.mxu1 %vm1392_vm2, %v1347_v24  ;;  %v1371_v24 = vmax.f32 %v1185_v59, 0.0  ;;  %v1217_v14 = vadd.f32 %v3252_v38, %v3633_v9  ;;  %v1363_v9 = vmax.f32 %v1153_v10, 0.0 }
 0x1c6   :  { %v3639_v49 = vpop.f32.mrf.mxu0 }
 0x1c8   :  { %v3643_v47 = vpop.f32.mrf.mxu0  ;;  %2615 = vmatpush3.xpose.msk.msra.mxu1 %vm1392_vm2, %v1331_v27 }
 0x1c9   :  { %2616 = vmatprep.subr.msk.mxu1 %vm1392_vm2, %v1346_v43 }
 0x1ca   :  { %v2794_v32 = vpop.f32.mrf.mxu0 }
 0x1cb   :  { %v1241_v31 = vadd.f32 %v2794_v32, %v3252_v38 }
 0x1cc   :  { %v1232_v45 = vpop.f32.mrf.mxu0  ;;  %2617 = vmatpush3.xpose.msk.msra.mxu1 %vm1392_vm2, %v1330_v62  ;;  %v1172_v62 = vadd.f32 %v3252_v38, %v3585_v56  ;;  %v1164_v56 = vadd.f32 %v3563_v53, %v3252_v38  ;;  %v1365_v53 = vmax.f32 %v1161_v37, 0.0 }
 0x1cd   :  { %2618 = vmatprep.subr.msk.mxu1 %vm1392_vm2, %v1345_v34  ;;  %v1385_v43 = vmax.f32 %v1241_v31, 0.0  ;;  %v1233_v32 = vadd.f32 %v3252_v38, %v1232_v45  ;;  %v1367_v45 = vmax.f32 %v1169_v39, 0.0 }
 0x1ce   :  { %v2795_v48 = vpop.f32.mrf.mxu0  ;;  %v1368_v30 = vmax.f32 %v1172_v62, 0.0 }
 0x1cf   :  { %v1244_v7 = vadd.f32 %v2795_v48, %v3252_v38  ;;  %v1383_v35 = vmax.f32 %v1233_v32, 0.0  ;;  %v1225_v48 = vadd.f32 %v3629_v3, %v3252_v38  ;;  %v1156_v3 = vadd.f32 %v3252_v38, %v3566_v23 }
 0x1d0   :  { %v1235_v52 = vpop.f32.mrf.mxu0  ;;  %2619 = vmatpush3.xpose.msk.msra.mxu1 %vm1392_vm2, %v1329_v1  ;;  %v1228_v1 = vadd.f32 %v3639_v49, %v3252_v38  ;;  %v1366_v49 = vmax.f32 %v1164_v56, 0.0  ;;  %v1148_v23 = vadd.f32 %v3545_v22, %v3252_v38  ;;  %v1361_v22 = vmax.f32 %v1145_v55, 0.0 }
 0x1d1   :  { %2620 = vmatprep.subr.msk.mxu1 %vm1392_vm2, %v1344_v25  ;;  %v1386_v27 = vmax.f32 %v1244_v7, 0.0  ;;  %v1236_v6 = vadd.f32 %v3252_v38, %v1235_v52  ;;  %v1381_v25 = vmax.f32 %v1225_v48, 0.0  ;;  %v1220_v52 = vadd.f32 %v3252_v38, %v3643_v47 }
 0x1d2   :  { %v2798_v51 = vpop.f32.mrf.mxu0  ;;  %v1382_v20 = vmax.f32 %v1228_v1, 0.0  ;;  %v1364_v47 = vmax.f32 %v1156_v3, 0.0 }
 0x1d3   :  { %v1257_v40 = vadd.f32 %v2798_v51, %v3252_v38  ;;  %v1384_v34 = vmax.f32 %v1236_v6, 0.0  ;;  %v1212_v51 = vadd.f32 %v3619_v17, %v3252_v38  ;;  %v1362_v17 = vmax.f32 %v1148_v23, 0.0 }
 0x1d4   :  { %v1248_v54 = vpop.f32.mrf.mxu0  ;;  %2621 = vmatpush3.xpose.msk.msra.mxu1 %vm1392_vm2, %v1328_v0  ;;  %v1380_v0 = vmax.f32 %v1220_v52, 0.0 }
 0x1d5   :  { %2622 = vmatprep.subr.msk.mxu1 %vm1392_vm2, %v1343_v41  ;;  %v1389_v46 = vmax.f32 %v1257_v40, 0.0  ;;  %v1249_v2 = vadd.f32 %v3252_v38, %v1248_v54  ;;  %v1379_v41 = vmax.f32 %v1217_v14, 0.0  ;;  %v1209_v54 = vadd.f32 %v3609_v63, %v3252_v38 }
 0x1d6   :  { %v2799_v12 = vpop.f32.mrf.mxu0  ;;  %v1140_v63 = vadd.f32 %v3252_v38, %v3548_v28  ;;  %v1201_v40 = vadd.f32 %v3252_v38, %v3613_v26  ;;  %v2873_v28 = vld [vmem:[%s3769_s4] sm:$0xff] }
 0x1d7   :  { %v1260_v19 = vadd.f32 %v2799_v12, %v3252_v38  ;;  %v1377_v57 = vmax.f32 %v1209_v54, 0.0  ;;  %v1204_v12 = vadd.f32 %v3252_v38, %v3623_v42 }
 0x1d8   :  { %v1251_v4 = vpop.f32.mrf.mxu0  ;;  %2623 = vmatpush3.xpose.msk.msra.mxu1 %vm1392_vm2, %v1327_v11  ;;  %v1378_v11 = vmax.f32 %v1212_v51, 0.0  ;;  %v1360_v42 = vmax.f32 %v1140_v63, 0.0 }
 0x1d9   :  { %v1390_v44 = vmax.f32 %v1260_v19, 0.0  ;;  %v1252_v18 = vadd.f32 %v3252_v38, %v1251_v4  ;;  %v1376_v19 = vmax.f32 %v1204_v12, 0.0  ;;  %v1375_v4 = vmax.f32 %v1201_v40, 0.0 }
 0x1db   :  { %2625 = vmatmul.mubr.msk.f32.vlgmr.msra.gmra.mxu1 %vm1392_vm2, %v3151_v58  ;;  %2626 = vmatprep.subr.msk.mxu1 %vm1392_vm2, %v1390_v44  ;;  %v1388_v13 = vmax.f32 %v1252_v18, 0.0  ;;  %v1359_v44 = vmax.f32 %v1137_v5, 0.0 }
 0x1dc   :  { %2627 = vmatpush3.xpose.msk.msra.mxu1 %vm1392_vm2, %v1374_v61  ;;  %2658 = vmatprep.mubr.msk.f32.mxu1 %vm1392_vm2, %v3151_v58  ;;  %v1387_v58 = vmax.f32 %v1249_v2, 0.0  ;;  %v2064_v2 = vld [vmem:[%s3766_s1] sm:$0xff]  ;;  %s2897_s1 = smov [#allocation2]  }
 0x1dd   :  { %2628 = vmatprep.subr.msk.mxu1 %vm1392_vm2, %v1389_v46  ;;  %v2067_v46 = vshrl.u32 %v2066_v8, 7  ;;  %s2179_s4 = sshll.u32 %s2897_s1, 4  ;;  %s2180_s4 = int_to_ptr.vmem [resolvable:$true] %s2179_s4 }
 0x1de   :  { %s2874_s9 = scalar_lea.vmem %s2180_s4, 128  ;;  %p2879_p1 = scmp.lt.s32.totalorder %s2180_s4, %s2180_s4 }
 0x1df   :  { %v2076_v60 = vsub.s32 2, %v2067_v46  ;;  %v2080_v18 = vsub.s32 3, %v2067_v46  ;;  %v2072_v29 = vsub.s32 1, %v2067_v46  ;;  %v2084_v59 = vsub.s32 4, %v2067_v46  ;;  %p2875_p0 = scmp.ne.s32.totalorder %s2180_s4, %s2874_s9  ;;  %p2880_p2 = scmp.lt.s32.totalorder %s2874_s9, %s2874_s9 }
 0x1e0   :  { %2629 = vmatpush3.xpose.msk.msra.mxu1 %vm1392_vm2, %v1373_v50  ;;  %v2068_v50 = vsub.s32 0, %v2067_v46  ;;  %v2096_v32 = vsub.s32 7, %v2067_v46 }
 0x1e1   :  { %2630 = vmatprep.subr.msk.mxu1 %vm1392_vm2, %v1388_v13  ;;  %v2081_v7 = vrot.slane %v2064_v2, %v2080_v18  ;;  %v2073_v31 = vrot.slane %v2064_v2, %v2072_v29  ;;  %p2881_p3 = por %p2880_p2, %p2879_p1 }
 0x1e3   :  { %p2882_p4 = pnand %p2881_p3, %p2875_p0 }
 0x1e4   :  { %2631 = vmatpush3.xpose.msk.msra.mxu1 %vm1392_vm2, %v1372_v36  ;;  %v2077_v36 = vrot.slane %v2064_v2, %v2076_v60 }
 0x1e5   :  { %2632 = vmatprep.subr.msk.mxu1 %vm1392_vm2, %v1387_v58  ;;  %v2088_v58 = vsub.s32 5, %v2067_v46 }
 0x1e7   :  { %v2089_v62 = vrot.slane %v2064_v2, %v2088_v58 }
 0x1e8   :  { %2633 = vmatpush3.xpose.msk.msra.mxu1 %vm1392_vm2, %v1371_v24  ;;  %v2069_v24 = vrot.slane %v2064_v2, %v2068_v50 }
 0x1e9   :  { %2634 = vmatprep.subr.msk.mxu1 %vm1392_vm2, %v1386_v27  ;;  %v2896_v27 = vmov 1966171168  }
 0x1ea   :  { %v2127_v16 = vunpack.c.l.s4 %v2896_v27 }
 0x1ec   :  { %2635 = vmatpush3.xpose.msk.msra.mxu1 %vm1392_vm2, %v1370_v21  ;;  %v2085_v21 = vrot.slane %v2064_v2, %v2084_v59  ;;  %v2128_v1 = vunpack.c.0.s8 %v2127_v16 }
 0x1ed   :  { %2636 = vmatprep.subr.msk.mxu1 %vm1392_vm2, %v1385_v43  ;;  %v2092_v43 = vsub.s32 6, %v2067_v46 }
 0x1f0   :  { %2637 = vmatpush3.xpose.msk.msra.mxu1 %vm1392_vm2, %v1369_v33 }
 0x1f1   :  { %2638 = vmatprep.subr.msk.mxu1 %vm1392_vm2, %v1384_v34 }
 0x1f4   :  { %2639 = vmatpush3.xpose.msk.msra.mxu1 %vm1392_vm2, %v1368_v30 }
 0x1f5   :  { %2640 = vmatprep.subr.msk.mxu1 %vm1392_vm2, %v1383_v35  ;;  %v2093_v35 = vrot.slane %v2064_v2, %v2092_v43 }
 0x1f8   :  { %2641 = vmatpush3.xpose.msk.msra.mxu1 %vm1392_vm2, %v1367_v45 }
 0x1f9   :  { %2642 = vmatprep.subr.msk.mxu1 %vm1392_vm2, %v1382_v20  ;;  %v2097_v20 = vrot.slane %v2064_v2, %v2096_v32 }
 0x1fc   :  { %2643 = vmatpush3.xpose.msk.msra.mxu1 %vm1392_vm2, %v1366_v49 }
 0x1fd   :  { %2644 = vmatprep.subr.msk.mxu1 %vm1392_vm2, %v1381_v25  ;;  %v2131_v25 = vsub.s32 %v2128_v1, %v2067_v46 }
 0x200   :  { %2645 = vmatpush3.xpose.msk.msra.mxu1 %vm1392_vm2, %v1365_v53 }
 0x201   :  { %2646 = vmatprep.subr.msk.mxu1 %vm1392_vm2, %v1380_v0 }
 0x204   :  { %2647 = vmatpush3.xpose.msk.msra.mxu1 %vm1392_vm2, %v1364_v47 }
 0x205   :  { %2648 = vmatprep.subr.msk.mxu1 %vm1392_vm2, %v1379_v41 }
 0x208   :  { %2649 = vmatpush3.xpose.msk.msra.mxu1 %vm1392_vm2, %v1363_v9 }
 0x209   :  { %2650 = vmatprep.subr.msk.mxu1 %vm1392_vm2, %v1378_v11 }
 0x20c   :  { %2651 = vmatpush3.xpose.msk.msra.mxu1 %vm1392_vm2, %v1362_v17 }
 0x20d   :  { %2652 = vmatprep.subr.msk.mxu1 %vm1392_vm2, %v1377_v57 }
 0x210   :  { %2653 = vmatpush3.xpose.msk.msra.mxu1 %vm1392_vm2, %v1361_v22 }
 0x211   :  { %2654 = vmatprep.subr.msk.mxu1 %vm1392_vm2, %v1376_v19 }
 0x214   :  { %2655 = vmatpush3.xpose.msk.msra.mxu1 %vm1392_vm2, %v1360_v42 }
 0x215   :  { %2656 = vmatprep.subr.msk.mxu1 %vm1392_vm2, %v1375_v4 }
 0x218   :  { %2657 = vmatpush3.xpose.msk.msra.mxu1 %vm1392_vm2, %v1359_v44 }
 0x21b   :  { %2659 = vmatmul.mubr.msk.f32.vlgmr.msra.gmra.mxu1 %vm1392_vm2, %v2873_v28  ;;  %v1846_v26 = vpop.f32.mrf.mxu1 }
 0x21c   :  { %v2106_v39 = vadd.f32 %v2069_v24, %v1846_v26 }
 0x21d   :  { %v1848_v61 = vpop.f32.mrf.mxu1 }
 0x21e   :  { %v2107_v30 = vadd.f32 %v2073_v31, %v1848_v61 }
 0x220   :  { %v2122_v49 = vcombine.low %v2106_v39, %v2107_v30 }
 0x222   :  { %v2132_v10 = vrot.slane %v2122_v49, %v2131_v25 }
 0x25b   :  { %v1917_v38 = vpop.f32.mrf.mxu1 }
 0x25c   :  { %v2108_v6 = vadd.f32 %v2077_v36, %v1917_v38 }
 0x25d   :  { %v1919_v13 = vpop.f32.mrf.mxu1 }
 0x25e   :  { %v2109_v33 = vadd.f32 %v2081_v7, %v1919_v13 }
 0x260   :  { %v2123_v56 = vcombine.low %v2108_v6, %v2109_v33 }
 0x262   :  { %v2139_v53 = vrot.slane %v2123_v56, %v2131_v25 }
 0x264   :  { %v2154_v23 = vcombine.low %v2132_v10, %v2139_v53 }
 0x266   :  { %v2162_v54 = vrot.slane %v2154_v23, %v2131_v25 }
 0x29b   :  { %v1988_v15 = vpop.f32.mrf.mxu1 }
 0x29c   :  { %v2110_v45 = vadd.f32 %v2085_v21, %v1988_v15 }
 0x29d   :  { %v1990_v34 = vpop.f32.mrf.mxu1 }
 0x29e   :  { %v2111_v48 = vadd.f32 %v2089_v62, %v1990_v34 }
 0x2a0   :  { %v2124_v3 = vcombine.low %v2110_v45, %v2111_v48 }
 0x2a2   :  { %v2146_v51 = vrot.slane %v2124_v3, %v2131_v25 }
 0x2db   :  { %v2059_v37 = vpop.f32.mrf.mxu1 }
 0x2dc   :  { %v2112_v14 = vadd.f32 %v2093_v35, %v2059_v37 }
 0x2dd   :  { %v2061_v52 = vpop.f32.mrf.mxu1 }
 0x2de   :  { %v2113_v0 = vadd.f32 %v2097_v20, %v2061_v52 }
 0x2e0   :  { %v2125_v47 = vcombine.low %v2112_v14, %v2113_v0 }
 0x2e2   :  { %v2153_v41 = vrot.slane %v2125_v47, %v2131_v25 }
 0x2e4   :  { %v2155_v9 = vcombine.low %v2146_v51, %v2153_v41 }
 0x2e6   :  { %v2169_v11 = vrot.slane %v2155_v9, %v2131_v25 }
 0x2e8   :  { %v2170_v55 = vcombine.low %v2162_v54, %v2169_v11 }
 0x2ea   :  { %2172 = vst [vmem:[#allocation2] sm:$0xff] %v2170_v55 }
 0x2eb   :  { %2885 = shalt.err (!%p2882_p4)
}
 0x2ec   :  { %2182 = dma.vmem_to_hbm [thread:$0]  %s2180_s4, 128, %s3770_s5, [#allocation3]  }
 0x2ed   :  { %2894 = dma.done.wait [#allocation3], 128  }
 0x2ee   :  { %2895 = vsyncadd [#allocation3], 4294967168 }
 0x2ef   :  { %2186 = vsyncpa [#allocation3], 1 }

</bundles_post_ra>
